<compile_context>
chip_gen: v7x
topology: tpu7x:2x2x1
jax: 0.10.0
libtpu: 0.0.40
codegen_flags: <defaults>
</compile_context>

<pallas_src>
import functools

import jax
import jax.numpy as jnp
from jax.experimental import pallas as pl
from jax.experimental.pallas import tpu as pltpu


def _channel_attention_kernel(x_ref, w1_ref, w2_ref, o_ref, sum_acc, max_acc,
                              *, hw, thw, nb):
    # x_ref  : (nb, C, thw)   batch-block of the input, HW streamed on lanes
    # w1_ref : (Ch, C)        conv1 weight (1x1 kernel squeezed)
    # w2_ref : (C, Ch)        conv2 weight
    # o_ref  : (nb, C, 1)     per-channel gate
    # sum_acc: (nb, C, thw) f32 running partial sums (per-lane, no XLU per step)
    # max_acc: (nb, C, thw) x.dtype running per-lane max
    j = pl.program_id(1)
    n_hw = pl.num_programs(1)

    x = x_ref[...]                                    # (nb, C, thw)

    if hw % thw != 0:
        # Ragged last tile: mask out-of-range lanes (static condition, only
        # traced when needed).
        pos = jax.lax.broadcasted_iota(jnp.int32, x.shape, 2)
        mask = pos < (hw - j * thw)
        x_max = jnp.where(mask, x, jnp.full_like(x, -jnp.inf))
        x_sum = jnp.where(mask, x.astype(jnp.float32), 0.0)
    else:
        x_max = x
        x_sum = x.astype(jnp.float32)

    @pl.when(j == 0)
    def _init():
        sum_acc[...] = x_sum
        max_acc[...] = x_max

    @pl.when(j > 0)
    def _accumulate():
        sum_acc[...] = sum_acc[...] + x_sum
        max_acc[...] = jnp.maximum(max_acc[...], x_max)

    @pl.when(j == n_hw - 1)
    def _finalize():
        # Single cross-lane reduce per batch block (XLU), then the tiny MLP.
        avg = jnp.sum(sum_acc[...], axis=-1, keepdims=True) * (1.0 / hw)  # (nb,C,1) f32
        mx = jnp.max(max_acc[...], axis=-1, keepdims=True).astype(jnp.float32)
        pooled = jnp.concatenate([avg, mx], axis=-1)                       # (nb, C, 2)

        w1 = w1_ref[...].astype(jnp.float32)   # (Ch, C)
        w2 = w2_ref[...].astype(jnp.float32)   # (C, Ch)

        gates = []
        for n in range(nb):  # nb is a small static int -> unrolled
            p = pooled[n]                                                   # (C, 2)
            h = jnp.dot(w1, p, preferred_element_type=jnp.float32)          # (Ch, 2)
            h = jnp.maximum(h, 0.0)                                         # ReLU
            y = jnp.dot(w2, h, preferred_element_type=jnp.float32)          # (C, 2)
            gates.append(jax.nn.sigmoid(y[:, 0:1] + y[:, 1:2]))             # (C, 1)
        o_ref[...] = jnp.stack(gates, axis=0).astype(o_ref.dtype)           # (nb, C, 1)


def _pick_tiles(N, C, HW, itemsize):
    """Pick (batch_block, hw_tile) for the streamed reduction."""
    # HW tile: whole HW when small; otherwise a lane-aligned streamed tile
    # sized so one (C, thw) input block is ~512 KiB.  Double-buffered input +
    # two accumulators then stay well under the scoped-VMEM defaults of
    # v5e (16 MiB) / v6e / v7x (32 MiB).
    if C * HW * itemsize <= 1024 * 1024:
        thw = HW
    else:
        thw = ((512 * 1024) // (C * itemsize)) // 128 * 128
        thw = max(128, min(thw, 2048))
    # Batch blocking: amortize the ~0.35 us per-grid-step overhead when the
    # per-step slab is tiny (small feature maps), but keep the batch axis
    # parallel (megacore) for large feature maps.
    nb = 1
    per_block = C * thw * itemsize
    while (nb * 2 <= N and N % (nb * 2) == 0
           and (nb * 2) * per_block <= 512 * 1024):
        nb *= 2
    return nb, thw


def channel_attention(x_nchw, w1, w2):
    """x_nchw: (N, C, H, W); w1: (Ch, C) conv1 weight; w2: (C, Ch) conv2 weight."""
    N, C, H, W = x_nchw.shape
    HW = H * W
    Ch = w1.shape[0]
    assert w1.shape == (Ch, C) and w2.shape == (C, Ch)

    # Free view of contiguous NCHW -> (N, C, HW); no transpose / extra HBM pass.
    x = x_nchw.reshape(N, C, HW)

    itemsize = x.dtype.itemsize
    nb, thw = _pick_tiles(N, C, HW, itemsize)
    n_hw = pl.cdiv(HW, thw)
    grid = (N // nb, n_hw)

    # VMEM budget: double-buffered input block + f32 sum acc + max acc +
    # (double-buffered) weights + output, with generous headroom.
    vmem_est = (2 * nb * C * thw * itemsize          # input (double-buffered)
                + nb * C * thw * 4                   # f32 sum accumulator
                + nb * C * thw * itemsize            # max accumulator
                + 2 * 2 * Ch * C * w1.dtype.itemsize # weights
                + 2 * nb * C * itemsize)             # output
    vmem_limit = int(min(max(4 * vmem_est, 16 * 1024 * 1024), 32 * 1024 * 1024))

    kernel = functools.partial(_channel_attention_kernel, hw=HW, thw=thw, nb=nb)

    out = pl.pallas_call(
        kernel,
        out_shape=jax.ShapeDtypeStruct((N, C, 1), x_nchw.dtype),
        grid_spec=pltpu.PrefetchScalarGridSpec(
            num_scalar_prefetch=0,
            grid=grid,
            in_specs=[
                pl.BlockSpec((nb, C, thw), lambda b, j: (b, 0, j)),  # streamed x
                pl.BlockSpec((Ch, C), lambda b, j: (0, 0)),          # full w1
                pl.BlockSpec((C, Ch), lambda b, j: (0, 0)),          # full w2
            ],
            out_specs=pl.BlockSpec((nb, C, 1), lambda b, j: (b, 0, 0)),
            scratch_shapes=[
                pltpu.VMEM((nb, C, thw), jnp.float32),   # running sums (f32)
                pltpu.VMEM((nb, C, thw), x.dtype),       # running max (input dtype)
            ],
        ),
        compiler_params=pltpu.CompilerParams(
            dimension_semantics=("parallel", "arbitrary"),
            vmem_limit_bytes=vmem_limit,
        ),
    )(x, w1, w2)

    return out.reshape(N, C, 1, 1)


def channel_attention_reference(x_nchw, w1, w2):
    avg = jnp.mean(x_nchw, axis=(2, 3))  # (N, C)
    mx = jnp.max(x_nchw, axis=(2, 3))    # (N, C)

    def mlp(v):
        h = jnp.maximum(v @ w1.T, 0.0)
        return h @ w2.T

    out = jax.nn.sigmoid(mlp(avg) + mlp(mx))
    return out[:, :, None, None]


if __name__ == "__main__":
    N, C, H, W = 2, 64, 16, 16
    ratio = 16
    Ch = C // ratio  # 4

    key = jax.random.PRNGKey(0)
    kx, k1, k2 = jax.random.split(key, 3)

    x = jax.random.normal(kx, (N, C, H, W), dtype=jnp.float32)
    # deterministic synthetic weights (PyTorch Conv2d weight shapes, 1x1 kernels squeezed)
    w1 = jax.random.normal(k1, (Ch, C), dtype=jnp.float32) * (1.0 / jnp.sqrt(C))
    w2 = jax.random.normal(k2, (C, Ch), dtype=jnp.float32) * (1.0 / jnp.sqrt(Ch))

    out = channel_attention(x, w1, w2)
    out = jax.block_until_ready(out)

    ref = channel_attention_reference(x, w1, w2)
    assert out.shape == (N, C, 1, 1), out.shape
    assert jnp.allclose(out, ref, atol=1e-5, rtol=1e-5), "mismatch vs reference"

    print("KERNEL_OK")
</pallas_src>

<mosaic_0001>
module attributes {stable_mosaic.version = 11 : i64} {
  func.func @_channel_attention_kernel(%arg0: i32, %arg1: i32, %arg2: memref<2x64x256xf32, #tpu.memory_space<vmem>>, %arg3: memref<4x64xf32, #tpu.memory_space<vmem>>, %arg4: memref<64x4xf32, #tpu.memory_space<vmem>>, %arg5: memref<2x64x1xf32, #tpu.memory_space<vmem>>, %arg6: memref<2x64x256xf32, #tpu.memory_space<vmem>>, %arg7: memref<2x64x256xf32, #tpu.memory_space<vmem>>) attributes {dimension_semantics = [#tpu.dimension_semantics<parallel>, #tpu.dimension_semantics<arbitrary>], iteration_bounds = array<i64: 1, 1>, scalar_prefetch = 0 : i64, scratch_operands = 2 : i64, tpu.core_type = #tpu.core_type<tc>, window_params = [{transform_indices = @transform_0, window_bounds = array<i64: 2, 64, 256>}, {pipeline_mode = #tpu.pipeline_mode<synchronous>, transform_indices = @transform_1, window_bounds = array<i64: 4, 64>}, {pipeline_mode = #tpu.pipeline_mode<synchronous>, transform_indices = @transform_2, window_bounds = array<i64: 64, 4>}, {transform_indices = @transform_3, window_bounds = array<i64: 2, 64, 1>}]} {
    %c0 = arith.constant 0 : index
    %c0_0 = arith.constant 0 : index
    %c0_1 = arith.constant 0 : index
    %0 = vector.load %arg2[%c0, %c0_0, %c0_1] : memref<2x64x256xf32, #tpu.memory_space<vmem>>, vector<2x64x256xf32>
    %c0_i32 = arith.constant 0 : i32
    %1 = arith.cmpi eq, %arg1, %c0_i32 : i32
    %2 = arith.extui %1 : i1 to i32
    %c0_i32_2 = arith.constant 0 : i32
    %3 = arith.cmpi ne, %2, %c0_i32_2 : i32
    scf.if %3 {
      %c0_7 = arith.constant 0 : index
      %c0_8 = arith.constant 0 : index
      %c0_9 = arith.constant 0 : index
      %10 = vector.load %arg6[%c0_7, %c0_8, %c0_9] : memref<2x64x256xf32, #tpu.memory_space<vmem>>, vector<2x64x256xf32>
      tpu.vector_store %arg6[%c0_7, %c0_8, %c0_9], %0 {strides = array<i32>} : memref<2x64x256xf32, #tpu.memory_space<vmem>>, vector<2x64x256xf32>,
      %c0_10 = arith.constant 0 : index
      %c0_11 = arith.constant 0 : index
      %c0_12 = arith.constant 0 : index
      %11 = vector.load %arg7[%c0_10, %c0_11, %c0_12] : memref<2x64x256xf32, #tpu.memory_space<vmem>>, vector<2x64x256xf32>
      tpu.vector_store %arg7[%c0_10, %c0_11, %c0_12], %0 {strides = array<i32>} : memref<2x64x256xf32, #tpu.memory_space<vmem>>, vector<2x64x256xf32>,
    } else {
    }
    %c0_i32_3 = arith.constant 0 : i32
    %4 = arith.cmpi sgt, %arg1, %c0_i32_3 : i32
    %5 = arith.extui %4 : i1 to i32
    %c0_i32_4 = arith.constant 0 : i32
    %6 = arith.cmpi ne, %5, %c0_i32_4 : i32
    scf.if %6 {
      %c0_7 = arith.constant 0 : index
      %c0_8 = arith.constant 0 : index
      %c0_9 = arith.constant 0 : index
      %10 = vector.load %arg6[%c0_7, %c0_8, %c0_9] : memref<2x64x256xf32, #tpu.memory_space<vmem>>, vector<2x64x256xf32>
      %11 = arith.addf %10, %0 : vector<2x64x256xf32>
      %c0_10 = arith.constant 0 : index
      %c0_11 = arith.constant 0 : index
      %c0_12 = arith.constant 0 : index
      %12 = vector.load %arg6[%c0_10, %c0_11, %c0_12] : memref<2x64x256xf32, #tpu.memory_space<vmem>>, vector<2x64x256xf32>
      tpu.vector_store %arg6[%c0_10, %c0_11, %c0_12], %11 {strides = array<i32>} : memref<2x64x256xf32, #tpu.memory_space<vmem>>, vector<2x64x256xf32>,
      %c0_13 = arith.constant 0 : index
      %c0_14 = arith.constant 0 : index
      %c0_15 = arith.constant 0 : index
      %13 = vector.load %arg7[%c0_13, %c0_14, %c0_15] : memref<2x64x256xf32, #tpu.memory_space<vmem>>, vector<2x64x256xf32>
      %14 = arith.maximumf %13, %0 : vector<2x64x256xf32>
      %c0_16 = arith.constant 0 : index
      %c0_17 = arith.constant 0 : index
      %c0_18 = arith.constant 0 : index
      %15 = vector.load %arg7[%c0_16, %c0_17, %c0_18] : memref<2x64x256xf32, #tpu.memory_space<vmem>>, vector<2x64x256xf32>
      tpu.vector_store %arg7[%c0_16, %c0_17, %c0_18], %14 {strides = array<i32>} : memref<2x64x256xf32, #tpu.memory_space<vmem>>, vector<2x64x256xf32>,
    } else {
    }
    %c0_i32_5 = arith.constant 0 : i32
    %7 = arith.cmpi eq, %arg1, %c0_i32_5 : i32
    %8 = arith.extui %7 : i1 to i32
    %c0_i32_6 = arith.constant 0 : i32
    %9 = arith.cmpi ne, %8, %c0_i32_6 : i32
    scf.if %9 {
      %c0_7 = arith.constant 0 : index
      %c0_8 = arith.constant 0 : index
      %c0_9 = arith.constant 0 : index
      %10 = vector.load %arg6[%c0_7, %c0_8, %c0_9] : memref<2x64x256xf32, #tpu.memory_space<vmem>>, vector<2x64x256xf32>
      %cst = arith.constant dense<0.000000e+00> : vector<2x64xf32>
      %11 = vector.multi_reduction <add>, %10, %cst [2] : vector<2x64x256xf32> to vector<2x64xf32>
      %12 = vector.shape_cast %11 : vector<2x64xf32> to vector<2x64x1xf32>
      %cst_10 = arith.constant 3.906250e-03 : f32
      %13 = vector.broadcast %cst_10 : f32 to vector<2x64x1xf32>
      %14 = arith.mulf %12, %13 : vector<2x64x1xf32>
      %c0_11 = arith.constant 0 : index
      %c0_12 = arith.constant 0 : index
      %c0_13 = arith.constant 0 : index
      %15 = vector.load %arg7[%c0_11, %c0_12, %c0_13] : memref<2x64x256xf32, #tpu.memory_space<vmem>>, vector<2x64x256xf32>
      %cst_14 = arith.constant dense<0xFF800000> : vector<2x64xf32>
      %16 = vector.multi_reduction <maximumf>, %15, %cst_14 [2] : vector<2x64x256xf32> to vector<2x64xf32>
      %17 = vector.shape_cast %16 : vector<2x64xf32> to vector<2x64x1xf32>
      %18 = tpu.concatenate %14, %17 in 2 : vector<2x64x1xf32>, vector<2x64x1xf32> -> vector<2x64x2xf32>
      %c0_15 = arith.constant 0 : index
      %c0_16 = arith.constant 0 : index
      %19 = vector.load %arg3[%c0_15, %c0_16] : memref<4x64xf32, #tpu.memory_space<vmem>>, vector<4x64xf32>
      %c0_17 = arith.constant 0 : index
      %c0_18 = arith.constant 0 : index
      %20 = vector.load %arg4[%c0_17, %c0_18] : memref<64x4xf32, #tpu.memory_space<vmem>>, vector<64x4xf32>
      %21 = vector.extract_strided_slice %18 {offsets = [0, 0, 0], sizes = [1, 64, 2], strides = [1, 1, 1]} : vector<2x64x2xf32> to vector<1x64x2xf32>
      %22 = vector.shape_cast %21 : vector<1x64x2xf32> to vector<64x2xf32>
      %cst_19 = arith.constant dense<0.000000e+00> : vector<4x2xf32>
      %23 = tpu.matmul %19, %22, %cst_19 {dimension_numbers = #tpu.dot_dimension_numbers<[1], [0], [0], [1], [0, 0, 1, 1], [], []>} : vector<4x64xf32>, vector<64x2xf32>, vector<4x2xf32> -> vector<4x2xf32>
      %cst_20 = arith.constant 0.000000e+00 : f32
      %24 = vector.broadcast %cst_20 : f32 to vector<4x2xf32>
      %25 = arith.maximumf %23, %24 : vector<4x2xf32>
      %cst_21 = arith.constant dense<0.000000e+00> : vector<64x2xf32>
      %26 = tpu.matmul %20, %25, %cst_21 {dimension_numbers = #tpu.dot_dimension_numbers<[1], [0], [0], [1], [0, 0, 1, 1], [], []>} : vector<64x4xf32>, vector<4x2xf32>, vector<64x2xf32> -> vector<64x2xf32>
      %27 = vector.extract_strided_slice %26 {offsets = [0, 0], sizes = [64, 1], strides = [1, 1]} : vector<64x2xf32> to vector<64x1xf32>
      %28 = vector.extract_strided_slice %26 {offsets = [0, 1], sizes = [64, 1], strides = [1, 1]} : vector<64x2xf32> to vector<64x1xf32>
      %29 = arith.addf %27, %28 : vector<64x1xf32>
      %30 = arith.negf %29 : vector<64x1xf32>
      %31 = math.exp %30 : vector<64x1xf32>
      %cst_22 = arith.constant 1.000000e+00 : f32
      %32 = vector.broadcast %cst_22 : f32 to vector<64x1xf32>
      %33 = arith.addf %32, %31 : vector<64x1xf32>
      %34 = arith.divf %32, %33 : vector<64x1xf32>
      %35 = vector.extract_strided_slice %18 {offsets = [1, 0, 0], sizes = [1, 64, 2], strides = [1, 1, 1]} : vector<2x64x2xf32> to vector<1x64x2xf32>
      %36 = vector.shape_cast %35 : vector<1x64x2xf32> to vector<64x2xf32>
      %cst_23 = arith.constant dense<0.000000e+00> : vector<4x2xf32>
      %37 = tpu.matmul %19, %36, %cst_23 {dimension_numbers = #tpu.dot_dimension_numbers<[1], [0], [0], [1], [0, 0, 1, 1], [], []>} : vector<4x64xf32>, vector<64x2xf32>, vector<4x2xf32> -> vector<4x2xf32>
      %cst_24 = arith.constant 0.000000e+00 : f32
      %38 = vector.broadcast %cst_24 : f32 to vector<4x2xf32>
      %39 = arith.maximumf %37, %38 : vector<4x2xf32>
      %cst_25 = arith.constant dense<0.000000e+00> : vector<64x2xf32>
      %40 = tpu.matmul %20, %39, %cst_25 {dimension_numbers = #tpu.dot_dimension_numbers<[1], [0], [0], [1], [0, 0, 1, 1], [], []>} : vector<64x4xf32>, vector<4x2xf32>, vector<64x2xf32> -> vector<64x2xf32>
      %41 = vector.extract_strided_slice %40 {offsets = [0, 0], sizes = [64, 1], strides = [1, 1]} : vector<64x2xf32> to vector<64x1xf32>
      %42 = vector.extract_strided_slice %40 {offsets = [0, 1], sizes = [64, 1], strides = [1, 1]} : vector<64x2xf32> to vector<64x1xf32>
      %43 = arith.addf %41, %42 : vector<64x1xf32>
      %44 = arith.negf %43 : vector<64x1xf32>
      %45 = math.exp %44 : vector<64x1xf32>
      %cst_26 = arith.constant 1.000000e+00 : f32
      %46 = vector.broadcast %cst_26 : f32 to vector<64x1xf32>
      %47 = arith.addf %46, %45 : vector<64x1xf32>
      %48 = arith.divf %46, %47 : vector<64x1xf32>
      %49 = vector.shape_cast %34 : vector<64x1xf32> to vector<1x64x1xf32>
      %50 = vector.shape_cast %48 : vector<64x1xf32> to vector<1x64x1xf32>
      %51 = tpu.concatenate %49, %50 in 0 : vector<1x64x1xf32>, vector<1x64x1xf32> -> vector<2x64x1xf32>
      %c0_27 = arith.constant 0 : index
      %c0_28 = arith.constant 0 : index
      %c0_29 = arith.constant 0 : index
      %52 = vector.load %arg5[%c0_27, %c0_28, %c0_29] : memref<2x64x1xf32, #tpu.memory_space<vmem>>, vector<2x64x1xf32>
      tpu.vector_store %arg5[%c0_27, %c0_28, %c0_29], %51 {strides = array<i32>} : memref<2x64x1xf32, #tpu.memory_space<vmem>>, vector<2x64x1xf32>,
    } else {
    }
    return
  }
  func.func @transform_0(%arg0: i32, %arg1: i32) -> (i32, i32, i32) {
    %c0_i32 = arith.constant 0 : i32
    %c0_i32_0 = arith.constant 0 : i32
    return %arg0, %c0_i32, %arg1 : i32, i32, i32
  }
  func.func @transform_1(%arg0: i32, %arg1: i32) -> (i32, i32) {
    %c0_i32 = arith.constant 0 : i32
    %c0_i32_0 = arith.constant 0 : i32
    %c0_i32_1 = arith.constant 0 : i32
    return %c0_i32, %c0_i32_0 : i32, i32
  }
  func.func @transform_2(%arg0: i32, %arg1: i32) -> (i32, i32) {
    %c0_i32 = arith.constant 0 : i32
    %c0_i32_0 = arith.constant 0 : i32
    %c0_i32_1 = arith.constant 0 : i32
    return %c0_i32, %c0_i32_0 : i32, i32
  }
  func.func @transform_3(%arg0: i32, %arg1: i32) -> (i32, i32, i32) {
    %c0_i32 = arith.constant 0 : i32
    %c0_i32_0 = arith.constant 0 : i32
    %c0_i32_1 = arith.constant 0 : i32
    return %arg0, %c0_i32, %c0_i32_0 : i32, i32, i32
  }
}

</mosaic_0001>

<bundles_post_ra>
// kernel: tpu_custom_call.1
= control target key start
LH: loop header
LB: loop body
LE: loop exit
PB: predicated region body
PF: predicated region fallthrough
CT: control target
= control target key end

     0   :  { %8 = vsyncpa [#allocation5], 0  ;;  %s1373_s12 = smov [#allocation4]   ;;  %s1583_s0 = inlined_call_operand.hbm [shape: f32[2,64,256], index: 0, kind: input, shape index: {}]   ;;  %s1584_s1 = inlined_call_operand.vmem [shape: f32[4,64], index: 1, kind: input, shape index: {}]   ;;  %s1585_s2 = inlined_call_operand.vmem [shape: f32[64,4], index: 2, kind: input, shape index: {}]   ;;  %s1586_s3 = inlined_call_operand.vmem [shape: f32[2,64,1], index: 3, kind: output, shape index: {}]  }
   0x1   :  { %s14_s13 = sshll.u32 %s1373_s12, 4  ;;  %s1349_s16 = scalar_lea.hbm %s1583_s0, 4096  ;;  %s15_s13 = int_to_ptr.vmem [resolvable:$true] %s14_s13 }
   0x2   :  { %p1350_p0 = scmp.ne.s32.totalorder %s1583_s0, %s1349_s16  ;;  %p1353_p1 = scmp.lt.u32.totalorder %s1349_s16, %s1583_s0 }
   0x4   :  { %p1355_p2 = pnand %p1353_p1, %p1350_p0 }
   0x6   :  { %1358 = shalt.err (!%p1355_p2)
}
   0x7   :  { %s1359_s21 = scalar_lea.vmem %s15_s13, 4096  ;;  %p1364_p4 = scmp.lt.s32.totalorder %s15_s13, %s15_s13 }
   0x8   :  { %p1360_p3 = scmp.ne.s32.totalorder %s15_s13, %s1359_s21  ;;  %p1365_p5 = scmp.lt.s32.totalorder %s1359_s21, %s1359_s21 }
   0xa   :  { %p1366_p6 = por %p1365_p5, %p1364_p4 }
   0xc   :  { %p1367_p7 = pnand %p1366_p6, %p1360_p3 }
   0xe   :  { %1370 = shalt.err (!%p1367_p7)
}
   0xf   :  { %s1374_s22 = smov 256   ;;  %s1375_s23 = smov 16  }
  0x10   :  { %20 = dma.hbm_to_vmem [thread:$0]  %s1583_s0, 4096, %s15_s13, [#allocation5], %s1374_s22, %s1374_s22, %s1375_s23  }
  0x11   :  { %1371 = dma.done.wait [#allocation5], 4096  }
  0x12   :  { %1372 = vsyncadd [#allocation5], 4294963200  ;;  %v28_v0 = vld [vmem:[#allocation4] sm:$0xff]  ;;  %v29_v1 = vld [vmem:[#allocation4 + $0x8] sm:$0xff]  ;;  %v1376_v30 = vmov 0.0|0.0   ;;  %vm1377_vm0 = vmmov 0  }
  0x13   :  { %v30_v2 = vld [vmem:[#allocation4 + $0x10] sm:$0xff]  ;;  %v455_v3 = vmax.f32 %v28_v0, %v29_v1  ;;  %v359_v4 = vadd.f32 %v29_v1, %v28_v0  ;;  %v31_v5 = vld [vmem:[#allocation4 + $0x18] sm:$0xff]  ;;  %v32_v10 = vld [vmem:[#allocation4 + $0x20] sm:$0xff]  ;;  %1252 = vmatprep.subr.bf16.mxu0 %v1376_v30  ;;  %v1378_v33 = vmov 0.0   ;;  %vm503_vm1 = vcmask 7168   ;;  %s1379_s15 = smov 127  }
  0x14   :  { %v458_v6 = vmax.f32 %v30_v2, %v31_v5  ;;  %v362_v7 = vadd.f32 %v31_v5, %v30_v2  ;;  %v34_v8 = vld [vmem:[#allocation4 + $0x30] sm:$0xff]  ;;  %v35_v9 = vld [vmem:[#allocation4 + $0x38] sm:$0xff]  ;;  %v33_v11 = vld [vmem:[#allocation4 + $0x28] sm:$0xff]  ;;  %1202 = vmatprep.mubr.msk.f32.mxu0 %vm1377_vm0, %v1378_v33  ;;  %vm529_vm2 = vcmask 523264   ;;  %vm604_vm3 = vcmask 31744  }
  0x15   :  { %456 = vmax.xlane.f32.xlu1 %v455_v3  ;;  %360 = vadd.xlane.f32.xlu0 %v359_v4  ;;  %v368_v12 = vadd.f32 %v35_v9, %v34_v8  ;;  %v365_v13 = vadd.f32 %v33_v11, %v32_v10  ;;  %v464_v14 = vmax.f32 %v34_v8, %v35_v9  ;;  %v38_v16 = vld [vmem:[#allocation4 + $0x50] sm:$0xff]  ;;  %v39_v17 = vld [vmem:[#allocation4 + $0x58] sm:$0xff]  ;;  %v36_v18 = vld [vmem:[#allocation4 + $0x40] sm:$0xff]  ;;  %vm629_vm4 = vcmask 1043456  }
  0x16   :  { %v461_v15 = vmax.f32 %v32_v10, %v33_v11  ;;  %v37_v19 = vld [vmem:[#allocation4 + $0x48] sm:$0xff]  ;;  %v374_v20 = vadd.f32 %v39_v17, %v38_v16  ;;  %v470_v22 = vmax.f32 %v38_v16, %v39_v17  ;;  %v42_v24 = vld [vmem:[#allocation4 + $0x70] sm:$0xff]  ;;  %v43_v25 = vld [vmem:[#allocation4 + $0x78] sm:$0xff] }
  0x17   :  { %v371_v21 = vadd.f32 %v37_v19, %v36_v18  ;;  %v467_v23 = vmax.f32 %v36_v18, %v37_v19  ;;  %v40_v26 = vld [vmem:[#allocation4 + $0x60] sm:$0xff]  ;;  %v41_v27 = vld [vmem:[#allocation4 + $0x68] sm:$0xff]  ;;  %v380_v28 = vadd.f32 %v43_v25, %v42_v24  ;;  %v476_v31 = vmax.f32 %v42_v24, %v43_v25  ;;  %v46_v34 = vld [vmem:[#allocation4 + $0x90] sm:$0xff] }
  0x18   :  { %v377_v29 = vadd.f32 %v41_v27, %v40_v26  ;;  %v473_v32 = vmax.f32 %v40_v26, %v41_v27  ;;  %v47_v35 = vld [vmem:[#allocation4 + $0x98] sm:$0xff]  ;;  %v44_v36 = vld [vmem:[#allocation4 + $0x80] sm:$0xff]  ;;  %v45_v38 = vld [vmem:[#allocation4 + $0x88] sm:$0xff] }
  0x19   :  { %459 = vmax.xlane.f32.xlu1 %v458_v6  ;;  %363 = vadd.xlane.f32.xlu0 %v362_v7  ;;  %v386_v37 = vadd.f32 %v47_v35, %v46_v34  ;;  %v383_v39 = vadd.f32 %v45_v38, %v44_v36  ;;  %v482_v40 = vmax.f32 %v46_v34, %v47_v35  ;;  %v50_v42 = vld [vmem:[#allocation4 + $0xb0] sm:$0xff]  ;;  %v51_v43 = vld [vmem:[#allocation4 + $0xb8] sm:$0xff]  ;;  %v48_v44 = vld [vmem:[#allocation4 + $0xa0] sm:$0xff] }
  0x1a   :  { %v479_v41 = vmax.f32 %v44_v36, %v45_v38  ;;  %v49_v45 = vld [vmem:[#allocation4 + $0xa8] sm:$0xff]  ;;  %v392_v46 = vadd.f32 %v51_v43, %v50_v42  ;;  %v488_v48 = vmax.f32 %v50_v42, %v51_v43  ;;  %v54_v50 = vld [vmem:[#allocation4 + $0xd0] sm:$0xff]  ;;  %v55_v51 = vld [vmem:[#allocation4 + $0xd8] sm:$0xff] }
  0x1b   :  { %v389_v47 = vadd.f32 %v49_v45, %v48_v44  ;;  %v485_v49 = vmax.f32 %v48_v44, %v49_v45  ;;  %v52_v52 = vld [vmem:[#allocation4 + $0xc0] sm:$0xff]  ;;  %v53_v53 = vld [vmem:[#allocation4 + $0xc8] sm:$0xff]  ;;  %v398_v54 = vadd.f32 %v55_v51, %v54_v50  ;;  %v494_v56 = vmax.f32 %v54_v50, %v55_v51  ;;  %v58_v58 = vld [vmem:[#allocation4 + $0xf0] sm:$0xff] }
  0x1c   :  { %v395_v55 = vadd.f32 %v53_v53, %v52_v52  ;;  %v491_v57 = vmax.f32 %v52_v52, %v53_v53  ;;  %v59_v59 = vld [vmem:[#allocation4 + $0xf8] sm:$0xff]  ;;  %v56_v60 = vld [vmem:[#allocation4 + $0xe0] sm:$0xff]  ;;  %v57_v61 = vld [vmem:[#allocation4 + $0xe8] sm:$0xff] }
  0x1d   :  { %369 = vadd.xlane.f32.xlu1 %v368_v12  ;;  %366 = vadd.xlane.f32.xlu0 %v365_v13  ;;  %v404_v62 = vadd.f32 %v59_v59, %v58_v58  ;;  %v401_v63 = vadd.f32 %v57_v61, %v56_v60  ;;  %v500_v0 = vmax.f32 %v58_v58, %v59_v59 }
  0x1e   :  { %v497_v1 = vmax.f32 %v56_v60, %v57_v61 }
  0x21   :  { %465 = vmax.xlane.f32.xlu1 %v464_v14  ;;  %462 = vmax.xlane.f32.xlu0 %v461_v15 }
  0x25   :  { %375 = vadd.xlane.f32.xlu1 %v374_v20  ;;  %372 = vadd.xlane.f32.xlu0 %v371_v21 }
  0x29   :  { %471 = vmax.xlane.f32.xlu1 %v470_v22  ;;  %468 = vmax.xlane.f32.xlu0 %v467_v23 }
  0x2d   :  { %381 = vadd.xlane.f32.xlu1 %v380_v28  ;;  %378 = vadd.xlane.f32.xlu0 %v377_v29 }
  0x31   :  { %477 = vmax.xlane.f32.xlu1 %v476_v31  ;;  %474 = vmax.xlane.f32.xlu0 %v473_v32 }
  0x35   :  { %387 = vadd.xlane.f32.xlu1 %v386_v37  ;;  %384 = vadd.xlane.f32.xlu0 %v383_v39 }
  0x39   :  { %483 = vmax.xlane.f32.xlu1 %v482_v40  ;;  %480 = vmax.xlane.f32.xlu0 %v479_v41  ;;  %v1429_v40 = vld [vmem:[%s1584_s1] sm:$0xf] }
  0x3a   :  { %v521_v41 = vld [vmem:[%s1585_s2] sm:$0xff] }
  0x3b   :  { %1207 = vmatprep.mubr.msk.f32.mxu1 %vm604_vm3, %v521_v41 }
  0x3d   :  { %393 = vadd.xlane.f32.xlu1 %v392_v46  ;;  %390 = vadd.xlane.f32.xlu0 %v389_v47 }
  0x41   :  { %489 = vmax.xlane.f32.xlu1 %v488_v48  ;;  %486 = vmax.xlane.f32.xlu0 %v485_v49 }
  0x45   :  { %399 = vadd.xlane.f32.xlu1 %v398_v54  ;;  %396 = vadd.xlane.f32.xlu0 %v395_v55 }
  0x49   :  { %495 = vmax.xlane.f32.xlu1 %v494_v56  ;;  %492 = vmax.xlane.f32.xlu0 %v491_v57 }
  0x4d   :  { %405 = vadd.xlane.f32.xlu1 %v404_v62  ;;  %402 = vadd.xlane.f32.xlu0 %v401_v63  ;;  %v1443_v63 = vld [vmem:[%s1585_s2 + $0x8] sm:$0xff] }
  0x51   :  { %501 = vmax.xlane.f32.xlu1 %v500_v0  ;;  %498 = vmax.xlane.f32.xlu0 %v497_v1  ;;  %v1449_v0 = vld [vmem:[%s1585_s2 + $0x10] sm:$0xff] }
  0xa2   :  { %v457_v2 = vpop.xlane.xlu1 %456  ;;  %v361_v3 = vpop.xlane.xlu0 %360 }
  0xa3   :  { %v407_v4 = vmul.f32 0.00390625, %v361_v3 }
  0xa5   :  { %v504_v8 = vsel %vm503_vm1, %v407_v4, %v457_v2 }
  0xa6   :  { %v460_v5 = vpop.xlane.xlu1 %459  ;;  %v364_v6 = vpop.xlane.xlu0 %363 }
  0xa7   :  { %v408_v7 = vmul.f32 0.00390625, %v364_v6 }
  0xa9   :  { %v505_v9 = vsel %vm503_vm1, %v408_v7, %v460_v5 }
  0xaa   :  { %v370_v10 = vpop.xlane.xlu1 %369  ;;  %v367_v11 = vpop.xlane.xlu0 %366  ;;  %v1253_v12 = vpack.c.bf16 %v505_v9, %v504_v8  ;;  %v524_v8 = vld [vmem:[%s1585_s2 + $0x18] sm:$0xff]  ;;  %v525_v9 = vld [vmem:[%s1585_s2 + $0x20] sm:$0xff] }
  0xab   :  { %v410_v13 = vmul.f32 0.00390625, %v370_v10  ;;  %v409_v14 = vmul.f32 0.00390625, %v367_v11 }
  0xac   :  { %1254 = vmatpush3.bf16.msra.mxu0 %v1253_v12 }
  0xad   :  { %1255 = vmatprep.subr.bf16.mxu0 %v1376_v30 }
  0xae   :  { %v466_v15 = vpop.xlane.xlu1 %465  ;;  %v463_v16 = vpop.xlane.xlu0 %462 }
  0xaf   :  { %v507_v17 = vsel %vm503_vm1, %v410_v13, %v466_v15  ;;  %v506_v18 = vsel %vm503_vm1, %v409_v14, %v463_v16 }
  0xb0   :  { %v1256_v19 = vpack.c.bf16 %v507_v17, %v506_v18  ;;  %v526_v17 = vld [vmem:[%s1585_s2 + $0x28] sm:$0xff]  ;;  %v527_v18 = vld [vmem:[%s1585_s2 + $0x30] sm:$0xff] }
  0xb2   :  { %v376_v20 = vpop.xlane.xlu1 %375  ;;  %1257 = vmatpush3.bf16.msra.mxu0 %v1256_v19  ;;  %v373_v21 = vpop.xlane.xlu0 %372 }
  0xb3   :  { %1258 = vmatprep.subr.bf16.mxu0 %v1376_v30  ;;  %v412_v22 = vmul.f32 0.00390625, %v376_v20  ;;  %v411_v23 = vmul.f32 0.00390625, %v373_v21 }
  0xb6   :  { %v472_v24 = vpop.xlane.xlu1 %471  ;;  %v469_v25 = vpop.xlane.xlu0 %468 }
  0xb7   :  { %v509_v26 = vsel %vm503_vm1, %v412_v22, %v472_v24  ;;  %v508_v27 = vsel %vm503_vm1, %v411_v23, %v469_v25  ;;  %v528_v22 = vld [vmem:[%s1585_s2 + $0x38] sm:$0xff] }
  0xb8   :  { %v1259_v28 = vpack.c.bf16 %v509_v26, %v508_v27 }
  0xba   :  { %v382_v29 = vpop.xlane.xlu1 %381  ;;  %1260 = vmatpush3.bf16.msra.mxu0 %v1259_v28  ;;  %v379_v31 = vpop.xlane.xlu0 %378 }
  0xbb   :  { %1261 = vmatprep.subr.bf16.mxu0 %v1376_v30  ;;  %v414_v32 = vmul.f32 0.00390625, %v382_v29  ;;  %v413_v34 = vmul.f32 0.00390625, %v379_v31 }
  0xbe   :  { %v478_v35 = vpop.xlane.xlu1 %477  ;;  %v475_v36 = vpop.xlane.xlu0 %474 }
  0xbf   :  { %v511_v37 = vsel %vm503_vm1, %v414_v32, %v478_v35  ;;  %v510_v38 = vsel %vm503_vm1, %v413_v34, %v475_v36 }
  0xc0   :  { %v1262_v39 = vpack.c.bf16 %v511_v37, %v510_v38 }
  0xc2   :  { %1263 = vmatpush3.bf16.msra.mxu0 %v1262_v39  ;;  %v388_v42 = vpop.xlane.xlu1 %387  ;;  %v385_v43 = vpop.xlane.xlu0 %384 }
  0xc3   :  { %v416_v52 = vmul.f32 0.00390625, %v388_v42  ;;  %v415_v53 = vmul.f32 0.00390625, %v385_v43 }
  0xc5   :  { %1203 = vmatmul.mubr.msk.f32.vlgmr.msra.gmra.mrb[0].mxu0 %vm529_vm2, %v1429_v40 }
  0xc6   :  { %1240 = vmatprep.mubr.msk.f32.mxu0 %vm604_vm3, %v521_v41  ;;  %v484_v44 = vpop.xlane.xlu1 %483  ;;  %v481_v45 = vpop.xlane.xlu0 %480 }
  0xc7   :  { %v513_v56 = vsel %vm503_vm1, %v416_v52, %v484_v44  ;;  %v512_v58 = vsel %vm503_vm1, %v415_v53, %v481_v45 }
  0xc8   :  { %v1265_v1 = vpack.c.bf16 %v513_v56, %v512_v58 }
  0xca   :  { %v394_v46 = vpop.xlane.xlu1 %393  ;;  %v391_v47 = vpop.xlane.xlu0 %390 }
  0xcb   :  { %v418_v59 = vmul.f32 0.00390625, %v394_v46  ;;  %v417_v60 = vmul.f32 0.00390625, %v391_v47 }
  0xce   :  { %v490_v48 = vpop.xlane.xlu1 %489  ;;  %v487_v49 = vpop.xlane.xlu0 %486 }
  0xcf   :  { %v515_v4 = vsel %vm503_vm1, %v418_v59, %v490_v48  ;;  %v514_v5 = vsel %vm503_vm1, %v417_v60, %v487_v49 }
  0xd0   :  { %v1268_v10 = vpack.c.bf16 %v515_v4, %v514_v5 }
  0xd2   :  { %v400_v50 = vpop.xlane.xlu1 %399  ;;  %v397_v51 = vpop.xlane.xlu0 %396 }
  0xd3   :  { %v420_v6 = vmul.f32 0.00390625, %v400_v50  ;;  %v419_v7 = vmul.f32 0.00390625, %v397_v51 }
  0xd6   :  { %v496_v54 = vpop.xlane.xlu1 %495  ;;  %v493_v55 = vpop.xlane.xlu0 %492 }
  0xd7   :  { %v517_v11 = vsel %vm503_vm1, %v420_v6, %v496_v54  ;;  %v516_v12 = vsel %vm503_vm1, %v419_v7, %v493_v55 }
  0xd8   :  { %v1271_v19 = vpack.c.bf16 %v517_v11, %v516_v12 }
  0xda   :  { %v406_v2 = vpop.xlane.xlu1 %405  ;;  %v403_v3 = vpop.xlane.xlu0 %402 }
  0xdb   :  { %v422_v13 = vmul.f32 0.00390625, %v406_v2  ;;  %v421_v14 = vmul.f32 0.00390625, %v403_v3 }
  0xde   :  { %v502_v15 = vpop.xlane.xlu1 %501  ;;  %v499_v16 = vpop.xlane.xlu0 %498 }
  0xdf   :  { %v519_v20 = vsel %vm503_vm1, %v422_v13, %v502_v15  ;;  %v518_v21 = vsel %vm503_vm1, %v421_v14, %v499_v16 }
  0xe0   :  { %v1274_v23 = vpack.c.bf16 %v519_v20, %v518_v21 }
 0x198   :  { %v599_v57 = vpop.f32.mrb[0].mxu0 }
 0x199   :  { %v603_v61 = vmax.f32 %v599_v57, 0.0  ;;  %v1204_v62 = vpop.f32.mrb[1].mxu0 }
 0x19b   :  { %1205 = vmatprep.subr.msk.mxu1 %vm629_vm4, %v603_v61 }
 0x19c   :  { %1206 = vmatpush3.msk.msra.mxu1 %vm629_vm4, %v603_v61 }
 0x19d   :  { %1208 = vmatmul.mubr.msk.f32.vlgmr.msra.gmra.mrb[0].mxu1 %vm604_vm3, %v1443_v63  ;;  %1264 = vmatprep.subr.bf16.mxu1 %v1376_v30 }
 0x19e   :  { %1266 = vmatpush3.bf16.msra.mxu1 %v1265_v1  ;;  %1210 = vmatprep.mubr.msk.f32.mxu1 %vm604_vm3, %v1449_v0 }
 0x19f   :  { %1267 = vmatprep.subr.bf16.mxu1 %v1376_v30 }
 0x1a1   :  { %1211 = vmatmul.mubr.msk.f32.gmra.mrb[2].mxu1 %vm604_vm3, %v524_v8 }
 0x1a2   :  { %1269 = vmatpush3.bf16.msra.mxu1 %v1268_v10  ;;  %1213 = vmatprep.mubr.msk.f32.mxu1 %vm604_vm3, %v525_v9 }
 0x1a3   :  { %1270 = vmatprep.subr.bf16.mxu1 %v1376_v30 }
 0x1a5   :  { %1214 = vmatmul.mubr.msk.f32.gmra.mrb[4].mxu1 %vm604_vm3, %v526_v17 }
 0x1a6   :  { %1272 = vmatpush3.bf16.msra.mxu1 %v1271_v19  ;;  %1216 = vmatprep.mubr.msk.f32.mxu1 %vm604_vm3, %v527_v18 }
 0x1a7   :  { %1273 = vmatprep.subr.bf16.mxu1 %v1376_v30 }
 0x1a9   :  { %1217 = vmatmul.mubr.msk.f32.gmra.mrb[6].mxu1 %vm604_vm3, %v528_v22 }
 0x1aa   :  { %1275 = vmatpush3.bf16.msra.mxu1 %v1274_v23  ;;  %1235 = vmatprep.mubr.msk.f32.mxu1 %vm1377_vm0, %v1378_v33 }
 0x1ad   :  { %1236 = vmatmul.mubr.msk.f32.vlgmr.msra.gmra.mrb[8].mxu1 %vm529_vm2, %v1429_v40 }
 0x1ae   :  { %1249 = vmatprep.mubr.msk.f32.mxu1 %vm604_vm3, %v527_v18 }
 0x270   :  { %v1209_v24 = vpop.f32.mrb[0].mxu1 }
 0x271   :  { %748 = vrot.lane.b32.xlu1 %v1209_v24, %s1379_s15  ;;  %v699_v25 = vpop.f32.mrb[1].mxu1 }
 0x272   :  { %746 = vrot.lane.b32.xlu0 %v699_v25, %s1379_s15 }
 0x274   :  { %v1212_v30 = vpop.f32.mrb[2].mxu1 }
 0x275   :  { %752 = vrot.lane.b32.xlu1 %v1212_v30, %s1379_s15  ;;  %v709_v26 = vpop.f32.mrb[3].mxu1 }
 0x278   :  { %v1215_v27 = vpop.f32.mrb[4].mxu1 }
 0x279   :  { %750 = vrot.lane.b32.xlu1 %v709_v26, %s1379_s15  ;;  %v719_v33 = vpop.f32.mrb[5].mxu1 }
 0x27a   :  { %754 = vrot.lane.b32.xlu0 %v719_v33, %s1379_s15 }
 0x27c   :  { %v1218_v28 = vpop.f32.mrb[6].mxu1 }
 0x27d   :  { %756 = vrot.lane.b32.xlu1 %v1215_v27, %s1379_s15  ;;  %v729_v29 = vpop.f32.mrb[7].mxu1 }
 0x27e   :  { %758 = vrot.lane.b32.xlu0 %v729_v29, %s1379_s15 }
 0x280   :  { %v892_v31 = vpop.f32.mrb[8].mxu1 }
 0x281   :  { %v896_v32 = vmax.f32 %v892_v31, 0.0  ;;  %760 = vrot.lane.b32.xlu1 %v1218_v28, %s1379_s15  ;;  %v1237_v34 = vpop.f32.mrb[9].mxu1 }
 0x283   :  { %1238 = vmatprep.subr.msk.mxu0 %vm629_vm4, %v896_v32  ;;  %1276 = vmatprep.subr.msk.mxu1 %vm629_vm4, %v896_v32 }
 0x284   :  { %1239 = vmatpush3.msk.msra.mxu0 %vm629_vm4, %v896_v32  ;;  %1277 = vmatpush3.msk.msra.mxu1 %vm629_vm4, %v896_v32 }
 0x285   :  { %1241 = vmatmul.mubr.msk.f32.vlgmr.msra.gmra.mrb[2].mxu0 %vm604_vm3, %v1443_v63  ;;  %1250 = vmatmul.mubr.msk.f32.vlgmr.msra.gmra.mrb[10].mxu1 %vm604_vm3, %v528_v22 }
 0x286   :  { %1243 = vmatprep.mubr.msk.f32.mxu0 %vm604_vm3, %v1449_v0 }
 0x289   :  { %1244 = vmatmul.mubr.msk.f32.gmra.mrb[4].mxu0 %vm604_vm3, %v524_v8 }
 0x28a   :  { %1246 = vmatprep.mubr.msk.f32.mxu0 %vm604_vm3, %v525_v9 }
 0x28d   :  { %1247 = vmatmul.mubr.msk.f32.gmra.mrb[6].mxu0 %vm604_vm3, %v526_v17 }
 0x2e3   :  { %v749_v35 = vpop.permute.xlu1 %748 }
 0x2e4   :  { %v771_v36 = vadd.f32 %v1209_v24, %v749_v35  ;;  %v747_v37 = vpop.permute.xlu0 %746 }
 0x2e5   :  { %v770_v38 = vadd.f32 %v747_v37, %v699_v25 }
 0x2e6   :  { %v1125_v39 = vmul.f32 -1.442695, %v771_v36 }
 0x2e7   :  { %v1124_v40 = vmul.f32 -1.442695, %v770_v38  ;;  %v753_v41 = vpop.permute.xlu1 %752 }
 0x2e8   :  { %1285 = vpow2.f32 %v1125_v39  ;;  %v773_v42 = vadd.f32 %v1212_v30, %v753_v41 }
 0x2e9   :  { %1287 = vpow2.f32 %v1124_v40 }
 0x2ea   :  { %v1127_v43 = vmul.f32 -1.442695, %v773_v42 }
 0x2eb   :  { %v751_v44 = vpop.permute.xlu1 %750 }
 0x2ec   :  { %1289 = vpow2.f32 %v1127_v43  ;;  %v772_v45 = vadd.f32 %v751_v44, %v709_v26  ;;  %v755_v46 = vpop.permute.xlu0 %754 }
 0x2ed   :  { %v774_v47 = vadd.f32 %v755_v46, %v719_v33 }
 0x2ee   :  { %v1126_v48 = vmul.f32 -1.442695, %v772_v45 }
 0x2ef   :  { %v1128_v49 = vmul.f32 -1.442695, %v774_v47  ;;  %v757_v50 = vpop.permute.xlu1 %756 }
 0x2f0   :  { %1291 = vpow2.f32 %v1126_v48  ;;  %v775_v51 = vadd.f32 %v1215_v27, %v757_v50  ;;  %v759_v52 = vpop.permute.xlu0 %758 }
 0x2f1   :  { %1293 = vpow2.f32 %v1128_v49  ;;  %v776_v53 = vadd.f32 %v759_v52, %v729_v29 }
 0x2f2   :  { %v1286_v54 = vpop.eup %1285  ;;  %v1129_v55 = vmul.f32 -1.442695, %v775_v51 }
 0x2f3   :  { %v1288_v56 = vpop.eup %1287  ;;  %v803_v57 = vadd.f32 1.0, %v1286_v54  ;;  %v1130_v58 = vmul.f32 -1.442695, %v776_v53  ;;  %v761_v59 = vpop.permute.xlu1 %760 }
 0x2f4   :  { %v802_v60 = vadd.f32 1.0, %v1288_v56  ;;  %1295 = vpow2.f32 %v1129_v55  ;;  %v777_v61 = vadd.f32 %v1218_v28, %v761_v59 }
 0x2f5   :  { %1297 = vrcp.f32 %v803_v57 }
 0x2f6   :  { %v1290_v62 = vpop.eup %1289  ;;  %1299 = vrcp.f32 %v802_v60  ;;  %v1131_v63 = vmul.f32 -1.442695, %v777_v61 }
 0x2f7   :  { %v805_v0 = vadd.f32 1.0, %v1290_v62  ;;  %1301 = vpow2.f32 %v1130_v58 }
 0x2f8   :  { %1303 = vpow2.f32 %v1131_v63 }
 0x2f9   :  { %1305 = vrcp.f32 %v805_v0 }
 0x2fa   :  { %v1292_v1 = vpop.eup %1291 }
 0x2fb   :  { %v1294_v2 = vpop.eup %1293  ;;  %v804_v3 = vadd.f32 1.0, %v1292_v1 }
 0x2fc   :  { %v806_v4 = vadd.f32 1.0, %v1294_v2 }
 0x2fd   :  { %1307 = vrcp.f32 %v804_v3 }
 0x2fe   :  { %v1296_v5 = vpop.eup %1295  ;;  %1309 = vrcp.f32 %v806_v4 }
 0x2ff   :  { %v1298_v6 = vpop.eup %1297  ;;  %v807_v7 = vadd.f32 1.0, %v1296_v5 }
 0x300   :  { %v1300_v8 = vpop.eup %1299  ;;  %1094 = vst.msk [vmem:[%s1586_s3 + $0x8] sm:$0xff] %vm503_vm1, %v1298_v6 }
 0x301   :  { %v1302_v9 = vpop.eup %1301  ;;  %1093 = vst.msk [vmem:[%s1586_s3] sm:$0xff] %vm503_vm1, %v1300_v8  ;;  %1311 = vrcp.f32 %v807_v7 }
 0x302   :  { %v1304_v10 = vpop.eup %1303  ;;  %v808_v11 = vadd.f32 1.0, %v1302_v9 }
 0x303   :  { %v1306_v12 = vpop.eup %1305  ;;  %v809_v13 = vadd.f32 1.0, %v1304_v10 }
 0x304   :  { %1096 = vst.msk [vmem:[%s1586_s3 + $0x18] sm:$0xff] %vm503_vm1, %v1306_v12  ;;  %1313 = vrcp.f32 %v808_v11 }
 0x305   :  { %1315 = vrcp.f32 %v809_v13 }
 0x307   :  { %v1308_v14 = vpop.eup %1307 }
 0x308   :  { %v1310_v15 = vpop.eup %1309  ;;  %1095 = vst.msk [vmem:[%s1586_s3 + $0x10] sm:$0xff] %vm503_vm1, %v1308_v14 }
 0x309   :  { %1097 = vst.msk [vmem:[%s1586_s3 + $0x20] sm:$0xff] %vm503_vm1, %v1310_v15 }
 0x30b   :  { %v1312_v16 = vpop.eup %1311 }
 0x30c   :  { %1098 = vst.msk [vmem:[%s1586_s3 + $0x28] sm:$0xff] %vm503_vm1, %v1312_v16 }
 0x30e   :  { %v1314_v17 = vpop.eup %1313 }
 0x30f   :  { %v1316_v18 = vpop.eup %1315  ;;  %1099 = vst.msk [vmem:[%s1586_s3 + $0x30] sm:$0xff] %vm503_vm1, %v1314_v17 }
 0x310   :  { %1100 = vst.msk [vmem:[%s1586_s3 + $0x38] sm:$0xff] %vm503_vm1, %v1316_v18 }
 0x358   :  { %v1242_v19 = vpop.f32.mrb[2].mxu0  ;;  %v1251_v20 = vpop.f32.mrb[10].mxu1 }
 0x359   :  { %1015 = vrot.lane.b32.xlu1 %v1242_v19, %s1379_s15  ;;  %v966_v21 = vpop.f32.mrb[3].mxu0  ;;  %v996_v22 = vpop.f32.mrb[11].mxu1 }
 0x35a   :  { %1013 = vrot.lane.b32.xlu0 %v966_v21, %s1379_s15 }
 0x35c   :  { %v1245_v23 = vpop.f32.mrb[4].mxu0 }
 0x35d   :  { %1019 = vrot.lane.b32.xlu1 %v1245_v23, %s1379_s15  ;;  %v976_v24 = vpop.f32.mrb[5].mxu0 }
 0x35e   :  { %1017 = vrot.lane.b32.xlu0 %v976_v24, %s1379_s15 }
 0x360   :  { %v1248_v25 = vpop.f32.mrb[6].mxu0 }
 0x361   :  { %1023 = vrot.lane.b32.xlu1 %v1248_v25, %s1379_s15  ;;  %v986_v30 = vpop.f32.mrb[7].mxu0 }
 0x362   :  { %1021 = vrot.lane.b32.xlu0 %v986_v30, %s1379_s15 }
 0x365   :  { %1027 = vrot.lane.b32.xlu1 %v1251_v20, %s1379_s15 }
 0x366   :  { %1025 = vrot.lane.b32.xlu0 %v996_v22, %s1379_s15 }
 0x3cb   :  { %v1016_v26 = vpop.permute.xlu1 %1015 }
 0x3cc   :  { %v1038_v27 = vadd.f32 %v1242_v19, %v1016_v26  ;;  %v1014_v33 = vpop.permute.xlu0 %1013 }
 0x3cd   :  { %v1037_v28 = vadd.f32 %v1014_v33, %v966_v21 }
 0x3ce   :  { %v1143_v29 = vmul.f32 -1.442695, %v1038_v27 }
 0x3cf   :  { %v1142_v31 = vmul.f32 -1.442695, %v1037_v28  ;;  %v1020_v32 = vpop.permute.xlu1 %1019 }
 0x3d0   :  { %1317 = vpow2.f32 %v1143_v29  ;;  %v1040_v34 = vadd.f32 %v1245_v23, %v1020_v32  ;;  %v1018_v35 = vpop.permute.xlu0 %1017 }
 0x3d1   :  { %1319 = vpow2.f32 %v1142_v31  ;;  %v1039_v36 = vadd.f32 %v1018_v35, %v976_v24 }
 0x3d2   :  { %v1145_v37 = vmul.f32 -1.442695, %v1040_v34 }
 0x3d3   :  { %v1144_v38 = vmul.f32 -1.442695, %v1039_v36  ;;  %v1024_v39 = vpop.permute.xlu1 %1023 }
 0x3d4   :  { %1321 = vpow2.f32 %v1145_v37  ;;  %v1042_v40 = vadd.f32 %v1248_v25, %v1024_v39  ;;  %v1022_v41 = vpop.permute.xlu0 %1021 }
 0x3d5   :  { %1323 = vpow2.f32 %v1144_v38  ;;  %v1041_v42 = vadd.f32 %v1022_v41, %v986_v30 }
 0x3d6   :  { %v1147_v43 = vmul.f32 -1.442695, %v1042_v40 }
 0x3d7   :  { %v1146_v44 = vmul.f32 -1.442695, %v1041_v42  ;;  %v1028_v45 = vpop.permute.xlu1 %1027 }
 0x3d8   :  { %1325 = vpow2.f32 %v1147_v43  ;;  %v1044_v46 = vadd.f32 %v1251_v20, %v1028_v45  ;;  %v1026_v47 = vpop.permute.xlu0 %1025 }
 0x3d9   :  { %1327 = vpow2.f32 %v1146_v44  ;;  %v1043_v48 = vadd.f32 %v1026_v47, %v996_v22 }
 0x3da   :  { %v1318_v49 = vpop.eup %1317  ;;  %v1149_v50 = vmul.f32 -1.442695, %v1044_v46 }
 0x3db   :  { %v1320_v51 = vpop.eup %1319  ;;  %v1070_v52 = vadd.f32 1.0, %v1318_v49  ;;  %v1148_v53 = vmul.f32 -1.442695, %v1043_v48 }
 0x3dc   :  { %v1069_v54 = vadd.f32 1.0, %v1320_v51  ;;  %1329 = vpow2.f32 %v1149_v50 }
 0x3dd   :  { %1331 = vrcp.f32 %v1070_v52 }
 0x3de   :  { %v1322_v55 = vpop.eup %1321  ;;  %1333 = vrcp.f32 %v1069_v54 }
 0x3df   :  { %v1324_v56 = vpop.eup %1323  ;;  %v1072_v57 = vadd.f32 1.0, %v1322_v55  ;;  %1335 = vpow2.f32 %v1148_v53 }
 0x3e0   :  { %v1071_v58 = vadd.f32 1.0, %v1324_v56 }
 0x3e1   :  { %1337 = vrcp.f32 %v1072_v57 }
 0x3e2   :  { %v1326_v59 = vpop.eup %1325  ;;  %1339 = vrcp.f32 %v1071_v58 }
 0x3e3   :  { %v1328_v60 = vpop.eup %1327  ;;  %v1074_v61 = vadd.f32 1.0, %v1326_v59 }
 0x3e4   :  { %v1073_v62 = vadd.f32 1.0, %v1328_v60 }
 0x3e5   :  { %1341 = vrcp.f32 %v1074_v61 }
 0x3e6   :  { %v1330_v63 = vpop.eup %1329  ;;  %1343 = vrcp.f32 %v1073_v62 }
 0x3e7   :  { %v1332_v0 = vpop.eup %1331  ;;  %v1076_v1 = vadd.f32 1.0, %v1330_v63 }
 0x3e8   :  { %v1334_v2 = vpop.eup %1333  ;;  %1102 = vst.msk [vmem:[%s1586_s3 + $0x48] sm:$0xff] %vm503_vm1, %v1332_v0 }
 0x3e9   :  { %v1336_v3 = vpop.eup %1335  ;;  %1101 = vst.msk [vmem:[%s1586_s3 + $0x40] sm:$0xff] %vm503_vm1, %v1334_v2  ;;  %1345 = vrcp.f32 %v1076_v1 }
 0x3ea   :  { %v1075_v4 = vadd.f32 1.0, %v1336_v3 }
 0x3eb   :  { %v1338_v5 = vpop.eup %1337 }
 0x3ec   :  { %v1340_v6 = vpop.eup %1339  ;;  %1104 = vst.msk [vmem:[%s1586_s3 + $0x58] sm:$0xff] %vm503_vm1, %v1338_v5  ;;  %1347 = vrcp.f32 %v1075_v4 }
 0x3ed   :  { %1103 = vst.msk [vmem:[%s1586_s3 + $0x50] sm:$0xff] %vm503_vm1, %v1340_v6 }
 0x3ef   :  { %v1342_v7 = vpop.eup %1341 }
 0x3f0   :  { %v1344_v8 = vpop.eup %1343  ;;  %1106 = vst.msk [vmem:[%s1586_s3 + $0x68] sm:$0xff] %vm503_vm1, %v1342_v7 }
 0x3f1   :  { %1105 = vst.msk [vmem:[%s1586_s3 + $0x60] sm:$0xff] %vm503_vm1, %v1344_v8 }
 0x3f3   :  { %v1346_v9 = vpop.eup %1345 }
 0x3f4   :  { %1108 = vst.msk [vmem:[%s1586_s3 + $0x78] sm:$0xff] %vm503_vm1, %v1346_v9 }
 0x3f6   :  { %v1348_v10 = vpop.eup %1347 }
 0x3f7   :  { %1107 = vst.msk [vmem:[%s1586_s3 + $0x70] sm:$0xff] %vm503_vm1, %v1348_v10 }
 0x3f8   :  { %1113 = vsyncpa [#allocation5], 1 }

</bundles_post_ra>
